<compile_context>
chip_gen: v5e
topology: v5e:2x2
jax: 0.10.0
libtpu: 0.0.40
codegen_flags: <defaults>
</compile_context>

<pallas_src>
import functools

import jax
import jax.numpy as jnp
from jax.experimental import pallas as pl
from jax.experimental.pallas import tpu as pltpu

LANE = 128     # vreg lane width
SUBLANE = 8    # vreg sublane width


def _round_up(x, m):
    return (x + m - 1) // m * m


def autoencoder_kernel(x_ref, w1_ref, b1_ref, w2_ref, b2_ref, out_ref):
    # x_ref: (TILE_B, D_in_p) bf16   w1_ref: (D_in_p, D_enc_p) bf16
    # b1_ref: (1, D_enc_p) f32       w2_ref: (D_enc_p, D_in_p) bf16
    # b2_ref: (1, D_in_p) f32        out_ref: (TILE_B, D_in_p) f32
    # Encoder: Linear + ReLU (bf16 MXU matmul, f32 accumulate + elementwise).
    h = jnp.dot(x_ref[...], w1_ref[...], preferred_element_type=jnp.float32)
    h = jnp.maximum(h + b1_ref[...], 0.0)
    # Decoder: Linear + Sigmoid. Cast hidden back to bf16 for the MXU.
    y = jnp.dot(h.astype(w2_ref.dtype), w2_ref[...],
                preferred_element_type=jnp.float32)
    y = y + b2_ref[...]
    out_ref[...] = jax.nn.sigmoid(y).astype(out_ref.dtype)


def prepare_params(w1, b1, w2, b2):
    """One-time layout prep (hoisted out of the per-call hot path).

    PyTorch nn.Linear convention in: w1 (D_enc, D_in), b1 (D_enc,),
                                     w2 (D_in, D_enc), b2 (D_in,).
    Out: weights transposed to (in, out), all feature dims zero-padded to a
    multiple of 128 lanes, matmul operands cast to bf16, biases kept f32.
    Zero padding is semantics-preserving: padded x columns hit zero w1 rows,
    padded hidden lanes are ReLU(0)=0 and hit zero w2 rows; padded output
    lanes are sliced off in the wrapper.
    """
    D_enc, D_in = w1.shape
    D_in_p = _round_up(D_in, LANE)
    D_enc_p = _round_up(D_enc, LANE)

    w1_t = jnp.zeros((D_in_p, D_enc_p), jnp.bfloat16)
    w1_t = w1_t.at[:D_in, :D_enc].set(
        jnp.asarray(w1, jnp.float32).T.astype(jnp.bfloat16))
    w2_t = jnp.zeros((D_enc_p, D_in_p), jnp.bfloat16)
    w2_t = w2_t.at[:D_enc, :D_in].set(
        jnp.asarray(w2, jnp.float32).T.astype(jnp.bfloat16))
    b1_p = jnp.zeros((1, D_enc_p), jnp.float32)
    b1_p = b1_p.at[0, :D_enc].set(jnp.asarray(b1, jnp.float32))
    b2_p = jnp.zeros((1, D_in_p), jnp.float32)
    b2_p = b2_p.at[0, :D_in].set(jnp.asarray(b2, jnp.float32))
    return w1_t, b1_p, w2_t, b2_p


@functools.partial(jax.jit, static_argnames=("tile_b",))
def autoencoder_forward(x, w1_t, b1_p, w2_t, b2_p, tile_b=1024):
    """x: (B, D_in) float32. Params: output of prepare_params()."""
    B, D_in = x.shape
    D_in_p, D_enc_p = w1_t.shape

    # Batch tile: big enough to amortize per-step overhead / keep the DMA
    # pipeline busy, clamped (to a multiple of 8 sublanes) for tiny batches.
    # bf16 x tile + f32 out tile, double-buffered, stays well under the 32 MiB
    # scoped VMEM default even on v7x (tile_b=1024 -> ~1.5 MiB total).
    tb = min(tile_b, _round_up(B, SUBLANE))
    B_p = _round_up(B, tb)

    # Pad batch + feature dims and cast x to bf16 (halves HBM->VMEM traffic).
    x_p = jnp.zeros((B_p, D_in_p), jnp.bfloat16)
    x_p = x_p.at[:B, :D_in].set(x.astype(jnp.bfloat16))

    grid = (B_p // tb,)
    out = pl.pallas_call(
        autoencoder_kernel,
        out_shape=jax.ShapeDtypeStruct((B_p, D_in_p), jnp.float32),
        grid=grid,
        in_specs=[
            # x: streamed per batch tile (auto double-buffered).
            pl.BlockSpec((tb, D_in_p), lambda i: (i, 0)),
            # weights/biases: constant block index -> VMEM-resident, no
            # re-DMA per grid step.
            pl.BlockSpec((D_in_p, D_enc_p), lambda i: (0, 0)),
            pl.BlockSpec((1, D_enc_p), lambda i: (0, 0)),
            pl.BlockSpec((D_enc_p, D_in_p), lambda i: (0, 0)),
            pl.BlockSpec((1, D_in_p), lambda i: (0, 0)),
        ],
        out_specs=pl.BlockSpec((tb, D_in_p), lambda i: (i, 0)),
        compiler_params=pltpu.CompilerParams(
            # Batch tiles are independent -> shard across v7x's 2 TensorCores.
            dimension_semantics=("parallel",),
        ),
    )(x_p, w1_t, b1_p, w2_t, b2_p)

    return out[:B, :D_in]


def init_params(key, input_dim, encoding_dim):
    """Deterministic init mimicking PyTorch nn.Linear default (U(-1/sqrt(fan_in), +))."""
    k1, k2, k3, k4 = jax.random.split(key, 4)
    bound1 = 1.0 / jnp.sqrt(input_dim)
    bound2 = 1.0 / jnp.sqrt(encoding_dim)
    w1 = jax.random.uniform(k1, (encoding_dim, input_dim), jnp.float32, -bound1, bound1)
    b1 = jax.random.uniform(k2, (encoding_dim,), jnp.float32, -bound1, bound1)
    w2 = jax.random.uniform(k3, (input_dim, encoding_dim), jnp.float32, -bound2, bound2)
    b2 = jax.random.uniform(k4, (input_dim,), jnp.float32, -bound2, bound2)
    return w1, b1, w2, b2


if __name__ == "__main__":
    key = jax.random.PRNGKey(0)
    B, input_dim, encoding_dim = 8, 32, 10

    kx, kp = jax.random.split(key)
    # MinMax-scaled features in [0, 1], like the preprocessing in the reference.
    x = jax.random.uniform(kx, (B, input_dim), jnp.float32, 0.0, 1.0)
    w1, b1, w2, b2 = init_params(kp, input_dim, encoding_dim)

    # One-time layout prep (hoisted out of the per-call path), then run.
    params = prepare_params(w1, b1, w2, b2)
    out = autoencoder_forward(x, *params)
    out = jax.block_until_ready(out)

    # Pure-JAX f32 reference. bf16 matmul operands -> looser tolerance.
    ref = jax.nn.sigmoid(jnp.maximum(x @ w1.T + b1, 0.0) @ w2.T + b2)
    assert out.shape == (B, input_dim)
    assert jnp.allclose(out, ref, atol=2e-2, rtol=2e-2), float(
        jnp.max(jnp.abs(out - ref)))

    print("KERNEL_OK")
</pallas_src>

<mosaic_0001>
module attributes {stable_mosaic.version = 11 : i64} {
  func.func @autoencoder_kernel(%arg0: i32, %arg1: memref<8x128xbf16, #tpu.memory_space<vmem>>, %arg2: memref<128x128xbf16, #tpu.memory_space<vmem>>, %arg3: memref<1x128xf32, #tpu.memory_space<vmem>>, %arg4: memref<128x128xbf16, #tpu.memory_space<vmem>>, %arg5: memref<1x128xf32, #tpu.memory_space<vmem>>, %arg6: memref<8x128xf32, #tpu.memory_space<vmem>>) attributes {dimension_semantics = [#tpu.dimension_semantics<parallel>], iteration_bounds = array<i64: 1>, scalar_prefetch = 0 : i64, scratch_operands = 0 : i64, tpu.core_type = #tpu.core_type<tc>, window_params = [{transform_indices = @transform_0, window_bounds = array<i64: 8, 128>}, {pipeline_mode = #tpu.pipeline_mode<synchronous>, transform_indices = @transform_1, window_bounds = array<i64: 128, 128>}, {pipeline_mode = #tpu.pipeline_mode<synchronous>, transform_indices = @transform_2, window_bounds = array<i64: 1, 128>}, {pipeline_mode = #tpu.pipeline_mode<synchronous>, transform_indices = @transform_3, window_bounds = array<i64: 128, 128>}, {pipeline_mode = #tpu.pipeline_mode<synchronous>, transform_indices = @transform_4, window_bounds = array<i64: 1, 128>}, {transform_indices = @transform_5, window_bounds = array<i64: 8, 128>}]} {
    %c0 = arith.constant 0 : index
    %c0_0 = arith.constant 0 : index
    %0 = vector.load %arg1[%c0, %c0_0] : memref<8x128xbf16, #tpu.memory_space<vmem>>, vector<8x128xbf16>
    %c0_1 = arith.constant 0 : index
    %c0_2 = arith.constant 0 : index
    %1 = vector.load %arg2[%c0_1, %c0_2] : memref<128x128xbf16, #tpu.memory_space<vmem>>, vector<128x128xbf16>
    %cst = arith.constant dense<0.000000e+00> : vector<8x128xf32>
    %2 = tpu.matmul %0, %1, %cst {dimension_numbers = #tpu.dot_dimension_numbers<[1], [0], [0], [1], [0, 0, 1, 1], [], []>} : vector<8x128xbf16>, vector<128x128xbf16>, vector<8x128xf32> -> vector<8x128xf32>
    %c0_3 = arith.constant 0 : index
    %c0_4 = arith.constant 0 : index
    %3 = vector.load %arg3[%c0_3, %c0_4] : memref<1x128xf32, #tpu.memory_space<vmem>>, vector<1x128xf32>
    %4 = vector.broadcast %3 : vector<1x128xf32> to vector<8x128xf32>
    %5 = arith.addf %2, %4 : vector<8x128xf32>
    %cst_5 = arith.constant 0.000000e+00 : f32
    %6 = vector.broadcast %cst_5 : f32 to vector<8x128xf32>
    %7 = arith.maximumf %5, %6 : vector<8x128xf32>
    %8 = arith.truncf %7 : vector<8x128xf32> to vector<8x128xbf16>
    %c0_6 = arith.constant 0 : index
    %c0_7 = arith.constant 0 : index
    %9 = vector.load %arg4[%c0_6, %c0_7] : memref<128x128xbf16, #tpu.memory_space<vmem>>, vector<128x128xbf16>
    %cst_8 = arith.constant dense<0.000000e+00> : vector<8x128xf32>
    %10 = tpu.matmul %8, %9, %cst_8 {dimension_numbers = #tpu.dot_dimension_numbers<[1], [0], [0], [1], [0, 0, 1, 1], [], []>} : vector<8x128xbf16>, vector<128x128xbf16>, vector<8x128xf32> -> vector<8x128xf32>
    %c0_9 = arith.constant 0 : index
    %c0_10 = arith.constant 0 : index
    %11 = vector.load %arg5[%c0_9, %c0_10] : memref<1x128xf32, #tpu.memory_space<vmem>>, vector<1x128xf32>
    %12 = vector.broadcast %11 : vector<1x128xf32> to vector<8x128xf32>
    %13 = arith.addf %10, %12 : vector<8x128xf32>
    %14 = arith.negf %13 : vector<8x128xf32>
    %15 = math.exp %14 : vector<8x128xf32>
    %cst_11 = arith.constant 1.000000e+00 : f32
    %16 = vector.broadcast %cst_11 : f32 to vector<8x128xf32>
    %17 = arith.addf %16, %15 : vector<8x128xf32>
    %18 = arith.divf %16, %17 : vector<8x128xf32>
    %c0_12 = arith.constant 0 : index
    %c0_13 = arith.constant 0 : index
    %19 = vector.load %arg6[%c0_12, %c0_13] : memref<8x128xf32, #tpu.memory_space<vmem>>, vector<8x128xf32>
    tpu.vector_store %arg6[%c0_12, %c0_13], %18 {strides = array<i32>} : memref<8x128xf32, #tpu.memory_space<vmem>>, vector<8x128xf32>,
    return
  }
  func.func @transform_0(%arg0: i32) -> (i32, i32) {
    %c0_i32 = arith.constant 0 : i32
    %c0_i32_0 = arith.constant 0 : i32
    return %arg0, %c0_i32 : i32, i32
  }
  func.func @transform_1(%arg0: i32) -> (i32, i32) {
    %c0_i32 = arith.constant 0 : i32
    %c0_i32_0 = arith.constant 0 : i32
    %c0_i32_1 = arith.constant 0 : i32
    return %c0_i32, %c0_i32_0 : i32, i32
  }
  func.func @transform_2(%arg0: i32) -> (i32, i32) {
    %c0_i32 = arith.constant 0 : i32
    %c0_i32_0 = arith.constant 0 : i32
    %c0_i32_1 = arith.constant 0 : i32
    return %c0_i32, %c0_i32_0 : i32, i32
  }
  func.func @transform_3(%arg0: i32) -> (i32, i32) {
    %c0_i32 = arith.constant 0 : i32
    %c0_i32_0 = arith.constant 0 : i32
    %c0_i32_1 = arith.constant 0 : i32
    return %c0_i32, %c0_i32_0 : i32, i32
  }
  func.func @transform_4(%arg0: i32) -> (i32, i32) {
    %c0_i32 = arith.constant 0 : i32
    %c0_i32_0 = arith.constant 0 : i32
    %c0_i32_1 = arith.constant 0 : i32
    return %c0_i32, %c0_i32_0 : i32, i32
  }
  func.func @transform_5(%arg0: i32) -> (i32, i32) {
    %c0_i32 = arith.constant 0 : i32
    %c0_i32_0 = arith.constant 0 : i32
    return %arg0, %c0_i32 : i32, i32
  }
}

</mosaic_0001>

<bundles_post_ra>
// kernel: autoencoder_forward.1
= control target key start
LH: loop header
LB: loop body
LE: loop exit
PB: predicated region body
PF: predicated region fallthrough
CT: control target
= control target key end

     0   :  { %10 = vsyncpa [#allocation3], 0  ;;  %s479_s0 = inlined_call_operand.vmem [shape: bf16[8,128], index: 0, kind: input, shape index: {}]   ;;  %s480_s1 = inlined_call_operand.hbm [shape: bf16[128,128], index: 1, kind: input, shape index: {}]   ;;  %s481_s2 = inlined_call_operand.vmem [shape: f32[1,128], index: 2, kind: input, shape index: {}]   ;;  %s482_s3 = inlined_call_operand.hbm [shape: bf16[128,128], index: 3, kind: input, shape index: {}]   ;;  %s483_s4 = inlined_call_operand.vmem [shape: f32[1,128], index: 4, kind: input, shape index: {}]   ;;  %s484_s5 = inlined_call_operand.hbm [shape: f32[8,128], index: 5, kind: output, shape index: {}]  }
   0x1   :  { %11 = vsyncpa [#allocation6], 0 }
   0x2   :  { %12 = vsyncpa [#allocation4], 0  ;;  %s19_s20 = sshll.u32 %s480_s1, 4  ;;  %s426_s21 = smov [#allocation2]   ;;  %s20_s20 = int_to_ptr.hbm [resolvable:$true] %s19_s20 }
   0x3   :  { %s21_s22 = sshll.u32 %s426_s21, 4  ;;  %s34_s25 = sshll.u32 %s482_s3, 4  ;;  %s22_s22 = int_to_ptr.vmem [resolvable:$true] %s21_s22  ;;  %s35_s25 = int_to_ptr.hbm [resolvable:$true] %s34_s25 }
   0x4   :  { %s427_s26 = smov 64   ;;  %s428_s27 = smov 4  }
   0x5   :  { %27 = dma.hbm_to_vmem [thread:$0]  %s20_s20, 1024, %s22_s22, [#allocation3], %s427_s26, %s427_s26, %s428_s27  }
   0x6   :  { %s429_s28 = smov [#allocation5]  }
   0x7   :  { %s36_s29 = sshll.u32 %s429_s28, 4  ;;  %s37_s29 = int_to_ptr.vmem [resolvable:$true] %s36_s29 }
   0x8   :  { %42 = dma.hbm_to_vmem [thread:$0]  %s35_s25, 1024, %s37_s29, [#allocation6], %s427_s26, %s427_s26, %s428_s27  }
   0x9   :  { %420 = dma.done.wait [#allocation3], 1024  }
   0xa   :  { %421 = vsyncadd [#allocation3], 4294966272 }
   0xb   :  { %422 = dma.done.wait [#allocation6], 1024  }
   0xc   :  { %423 = vsyncadd [#allocation6], 4294966272  ;;  %v328_v0 = vld [vmem:[#allocation2 + $0x38] sm:$0xff]  ;;  %v327_v1 = vld [vmem:[#allocation2 + $0x30] sm:$0xff] }
   0xd   :  { %122 = vmatpush.bf16.msra.mxu0 %v328_v0  ;;  %v336_v2 = vld [vmem:[#allocation5 + $0x38] sm:$0xff]  ;;  %v335_v3 = vld [vmem:[#allocation5 + $0x30] sm:$0xff]  ;;  %v326_v4 = vld [vmem:[#allocation2 + $0x28] sm:$0xff] }
   0xe   :  { %205 = vmatpush.bf16.msra.mxu1 %v336_v2  ;;  %v334_v5 = vld [vmem:[#allocation5 + $0x28] sm:$0xff]  ;;  %v325_v6 = vld [vmem:[#allocation2 + $0x20] sm:$0xff]  ;;  %v324_v8 = vld [vmem:[#allocation2 + $0x18] sm:$0xff] }
   0xf   :  { %v333_v7 = vld [vmem:[#allocation5 + $0x20] sm:$0xff]  ;;  %v332_v9 = vld [vmem:[#allocation5 + $0x18] sm:$0xff]  ;;  %v323_v10 = vld [vmem:[#allocation2 + $0x10] sm:$0xff] }
  0x10   :  { %v331_v11 = vld [vmem:[#allocation5 + $0x10] sm:$0xff]  ;;  %v322_v12 = vld [vmem:[#allocation2 + $0x8] sm:$0xff]  ;;  %v321_v13 = vld [vmem:[#allocation2] sm:$0xff] }
  0x11   :  { %123 = vmatpush.bf16.msra.mxu0 %v327_v1  ;;  %v53_v14 = vld [vmem:[%s479_s0] sm:$0xf]  ;;  %v330_v15 = vld [vmem:[#allocation5 + $0x8] sm:$0xff]  ;;  %s430_s0 = smov [#allocation7]  }
  0x12   :  { %206 = vmatpush.bf16.msra.mxu1 %v335_v3  ;;  %v329_v16 = vld [vmem:[#allocation5] sm:$0xff] }
  0x13   :  { %v342_v17 = vld [vmem:[%s481_s2] ss:$0 sm:$0xff]  ;;  %s243_s2 = sshll.u32 %s430_s0, 4  ;;  %s244_s2 = int_to_ptr.vmem [resolvable:$true] %s243_s2 }
  0x14   :  { %v343_v23 = vld [vmem:[%s483_s4] ss:$0 sm:$0xff]  ;;  %s245_s4 = sshll.u32 %s484_s5, 4  ;;  %s246_s4 = int_to_ptr.hbm [resolvable:$true] %s245_s4 }
  0x15   :  { %124 = vmatpush.bf16.msra.mxu0 %v326_v4 }
  0x16   :  { %207 = vmatpush.bf16.msra.mxu1 %v334_v5 }
  0x19   :  { %125 = vmatpush.bf16.msra.mxu0 %v325_v6 }
  0x1a   :  { %208 = vmatpush.bf16.msra.mxu1 %v333_v7 }
  0x1d   :  { %126 = vmatpush.bf16.msra.mxu0 %v324_v8 }
  0x1e   :  { %209 = vmatpush.bf16.msra.mxu1 %v332_v9 }
  0x21   :  { %127 = vmatpush.bf16.msra.mxu0 %v323_v10 }
  0x22   :  { %210 = vmatpush.bf16.msra.mxu1 %v331_v11 }
  0x25   :  { %128 = vmatpush.bf16.msra.mxu0 %v322_v12 }
  0x26   :  { %211 = vmatpush.bf16.msra.mxu1 %v330_v15 }
  0x29   :  { %129 = vmatpush.bf16.msra.mxu0 %v321_v13 }
  0x2a   :  { %212 = vmatpush.bf16.msra.mxu1 %v329_v16 }
  0x2c   :  { %130 = vmatmul.bf16.vlgmr.msra.gmra.mxu0 %v53_v14 }
  0xa9   :  { %v131_v18 = vpop.f32.mrf.mxu0 }
  0xaa   :  { %v132_v19 = vadd.f32 %v342_v17, %v131_v18 }
  0xac   :  { %v135_v20 = vmax.f32 %v132_v19, 0.0 }
  0xae   :  { %v136_v21 = vpack.c.bf16 %v135_v20, %v135_v20 }
  0xb0   :  { %213 = vmatmul.bf16.vlgmr.msra.gmra.mxu1 %v136_v21 }
  0xb1   :  { %v133_v22 = vpop.f32.mrf.mxu0 }
 0x12d   :  { %v214_v24 = vpop.f32.mrf.mxu1 }
 0x12e   :  { %v215_v25 = vadd.f32 %v343_v23, %v214_v24 }
 0x130   :  { %v320_v26 = vmul.f32 -1.442695, %v215_v25 }
 0x132   :  { %344 = vpow2.f32 %v320_v26 }
 0x135   :  { %v216_v27 = vpop.f32.mrf.mxu1 }
 0x138   :  { %v345_v28 = vpop.eup %344 }
 0x139   :  { %v221_v29 = vadd.f32 1.0, %v345_v28 }
 0x13b   :  { %346 = vrcp.f32 %v221_v29  ;;  %v233_v33 = vand.u32 2147483648, %v221_v29  ;;  %v231_v35 = vand.u32 2147483647, %v221_v29  ;;  %vm227_vm1 = vweird.f32 %v221_v29 }
 0x13d   :  { %v234_v37 = vor.u32 1.1754944e-38, %v233_v33  ;;  %vm232_vm3 = vcmp.eq.f32.partialorder %v231_v35, 8.507059e+37 }
 0x141   :  { %v347_v30 = vpop.eup %346 }
 0x142   :  { %v223_v31 = vmul.f32 %v347_v30, %v221_v29  ;;  %vm228_vm0 = vweird.f32 %v347_v30 }
 0x143   :  { %vm229_vm2 = vmor %vm227_vm1, %vm228_vm0 }
 0x144   :  { %v224_v32 = vsub.f32 1.0, %v223_v31 }
 0x146   :  { %v225_v34 = vmul.f32 %v347_v30, %v224_v32 }
 0x148   :  { %v226_v36 = vadd.f32 %v347_v30, %v225_v34 }
 0x14a   :  { %v230_v38 = vsel %vm229_vm2, %v347_v30, %v226_v36 }
 0x14b   :  { %v235_v39 = vsel %vm232_vm3, %v234_v37, %v230_v38 }
 0x14c   :  { %237 = vst [vmem:[#allocation7] sm:$0xff] %v235_v39 }
 0x14d   :  { %248 = dma.vmem_to_hbm [thread:$0]  %s244_s2, 128, %s246_s4, [#allocation4]  }
 0x14e   :  { %424 = dma.done.wait [#allocation4], 128  }
 0x14f   :  { %425 = vsyncadd [#allocation4], 4294967168 }
 0x150   :  { %253 = vsyncpa [#allocation3], 1 }
 0x151   :  { %254 = vsyncpa [#allocation6], 1 }
 0x152   :  { %255 = vsyncpa [#allocation4], 1 }

</bundles_post_ra>
